<compile_context>
chip_gen: v7x
topology: tpu7x:2x2x1
jax: 0.10.0
libtpu: 0.0.40
codegen_flags: <defaults>
</compile_context>

<pallas_src>
import functools

import jax
import jax.numpy as jnp
from jax.experimental import pallas as pl
from jax.experimental.pallas import tpu as pltpu


def _round_up(x, m):
    return ((x + m - 1) // m) * m


def _ffn_clique_kernel(n_layers, *refs):
    """Kernel body. refs = (xT_ref, w0, b0, w1, b1, ..., w_{L-1}, b_{L-1}, out_ref).

    Batch-on-lanes: xT_ref is (D_in, tile_m); every intermediate h is
    (features, tile_m) with tile_m (a multiple of 128) dense on the lane axis.
    """
    xT_ref = refs[0]
    out_ref = refs[-1]
    param_refs = refs[1:-1]

    h = xT_ref[...].astype(jnp.float32)                       # (D_in, tile_m)
    for li in range(n_layers):
        w = param_refs[2 * li][...]                           # (out, in) torch layout
        b = param_refs[2 * li + 1][...].astype(jnp.float32)   # (out, 1)
        h = jnp.dot(w, h.astype(w.dtype),
                    preferred_element_type=jnp.float32) + b   # (out, tile_m), f32 acc
        if li < n_layers - 1:
            h = jnp.maximum(h, 0.0)                           # ReLU on hidden layers
        else:
            # sigmoid(x) = 1 / (1 + exp(-x)); exp + approx reciprocal both run
            # on the otherwise-idle EUP slot instead of a VALU divide sequence.
            h = pl.reciprocal(1.0 + jnp.exp(-h), approx=True)
    out_ref[...] = h.astype(out_ref.dtype)                    # (1, tile_m) lane-dense store


def ffn_clique_forward(x, weights, biases, *, tile_m=512, compute_dtype=jnp.float32):
    """Run the full MLP in a single Pallas kernel, tiled over the batch axis.

    x:       (B, D_in) float32
    weights: list of torch-layout (D_{i+1}, D_i) matrices
    biases:  list of (D_{i+1},) vectors
    compute_dtype: dtype of the matmul operands (use jnp.bfloat16 on v6e/v7x);
                   accumulation, bias and activations stay in float32.
    returns: (B, 1) float32
    """
    B, d_in = x.shape
    n_layers = len(weights)

    # --- batch tiling: big lane-aligned tiles, no divisibility demands on B ---
    tile_m = max(128, _round_up(min(tile_m, _round_up(B, 128)), 128))
    b_pad = _round_up(B, tile_m)
    if b_pad // tile_m < 2 and tile_m >= 256:
        tile_m //= 2            # keep >= 2 "parallel" grid steps (v7x megacore)
        b_pad = _round_up(B, tile_m)
    grid = b_pad // tile_m

    # --- batch-on-lanes: feed x^T so batch sits on the 128-lane axis ---------
    xT = jnp.pad(x.T, ((0, 0), (0, b_pad - B))).astype(compute_dtype)  # (d_in, b_pad)

    # Weights stay in torch (out, in); biases become (out, 1) columns so they
    # lane-broadcast against the (out, tile_m) activations.
    params = []
    for w, b in zip(weights, biases):
        params.append(jnp.asarray(w).astype(compute_dtype))
        params.append(jnp.asarray(b).reshape(-1, 1).astype(jnp.float32))

    # x^T tiled along the lane (batch) axis; weights/biases are tiny and use a
    # constant index_map, so Pallas only moves them on the first grid step.
    in_specs = [pl.BlockSpec((d_in, tile_m), lambda i: (0, i))]
    for p in params:
        in_specs.append(pl.BlockSpec(p.shape, lambda i: (0, 0)))

    # Lane-dense (1, b_pad) output row: unmasked 128-wide stores instead of the
    # masked single-lane stores a (B, 1) column layout would force.
    out_specs = pl.BlockSpec((1, tile_m), lambda i: (0, i))

    kernel = functools.partial(_ffn_clique_kernel, n_layers)

    out = pl.pallas_call(
        kernel,
        out_shape=jax.ShapeDtypeStruct((1, b_pad), jnp.float32),
        grid_spec=pltpu.PrefetchScalarGridSpec(
            num_scalar_prefetch=0,
            grid=(grid,),
            in_specs=in_specs,
            out_specs=out_specs,
        ),
        compiler_params=pltpu.CompilerParams(
            dimension_semantics=("parallel",),
        ),
    )(xT, *params)

    return out[0, :B].reshape(B, 1)


def init_params(key, layer_dims):
    """torch.nn.Linear-style params: weight (out, in), bias (out,)."""
    weights, biases = [], []
    for fan_in, fan_out in zip(layer_dims[:-1], layer_dims[1:]):
        key, kw, kb = jax.random.split(key, 3)
        bound = 1.0 / jnp.sqrt(fan_in)
        w = jax.random.uniform(kw, (fan_out, fan_in), jnp.float32, -bound, bound)
        b = jax.random.uniform(kb, (fan_out,), jnp.float32, -bound, bound)
        weights.append(w)
        biases.append(b)
    return weights, biases


def reference_forward(x, weights, biases):
    """Pure-JAX reference matching the torch module (eval mode)."""
    h = x
    for i, (w, b) in enumerate(zip(weights, biases)):
        h = h @ w.T + b
        if i < len(weights) - 1:
            h = jnp.maximum(h, 0.0)
    return jax.nn.sigmoid(h)


if __name__ == "__main__":
    # FFNClique(input_shape=16, hidden_layers=[32, 32], dropouts=[0.0, 0.0])
    input_shape = 16
    hidden_layers = [32, 32]
    layer_dims = [input_shape] + hidden_layers + [1]

    batch = 256  # -> tile_m=128, grid=2 ("parallel" steps for both v7x cores)
    key = jax.random.PRNGKey(0)
    kx, kp = jax.random.split(key)
    x = jax.random.normal(kx, (batch, input_shape), jnp.float32)
    weights, biases = init_params(kp, layer_dims)

    out = ffn_clique_forward(x, weights, biases)
    out = jax.block_until_ready(out)

    ref = reference_forward(x, weights, biases)
    assert out.shape == (batch, 1), out.shape
    err = float(jnp.max(jnp.abs(out - ref)))
    # Tolerance loosened for the approx-reciprocal sigmoid epilogue.
    assert err < 5e-3, err
    print("KERNEL_OK")
</pallas_src>

<mosaic_0001>
module attributes {stable_mosaic.version = 11 : i64} {
  func.func @_ffn_clique_kernel(%arg0: i32, %arg1: memref<16x128xf32, #tpu.memory_space<vmem>>, %arg2: memref<32x16xf32, #tpu.memory_space<vmem>>, %arg3: memref<32x1xf32, #tpu.memory_space<vmem>>, %arg4: memref<32x32xf32, #tpu.memory_space<vmem>>, %arg5: memref<32x1xf32, #tpu.memory_space<vmem>>, %arg6: memref<1x32xf32, #tpu.memory_space<vmem>>, %arg7: memref<1x1xf32, #tpu.memory_space<vmem>>, %arg8: memref<1x128xf32, #tpu.memory_space<vmem>>) attributes {dimension_semantics = [#tpu.dimension_semantics<parallel>], iteration_bounds = array<i64: 2>, scalar_prefetch = 0 : i64, scratch_operands = 0 : i64, tpu.core_type = #tpu.core_type<tc>, window_params = [{transform_indices = @transform_0, window_bounds = array<i64: 16, 128>}, {pipeline_mode = #tpu.pipeline_mode<synchronous>, transform_indices = @transform_1, window_bounds = array<i64: 32, 16>}, {pipeline_mode = #tpu.pipeline_mode<synchronous>, transform_indices = @transform_2, window_bounds = array<i64: 32, 1>}, {pipeline_mode = #tpu.pipeline_mode<synchronous>, transform_indices = @transform_3, window_bounds = array<i64: 32, 32>}, {pipeline_mode = #tpu.pipeline_mode<synchronous>, transform_indices = @transform_4, window_bounds = array<i64: 32, 1>}, {pipeline_mode = #tpu.pipeline_mode<synchronous>, transform_indices = @transform_5, window_bounds = array<i64: 1, 32>}, {pipeline_mode = #tpu.pipeline_mode<synchronous>, transform_indices = @transform_6, window_bounds = array<i64: 1, 1>}, {transform_indices = @transform_7, window_bounds = array<i64: 1, 128>}]} {
    %c0 = arith.constant 0 : index
    %c0_0 = arith.constant 0 : index
    %0 = vector.load %arg1[%c0, %c0_0] : memref<16x128xf32, #tpu.memory_space<vmem>>, vector<16x128xf32>
    %c0_1 = arith.constant 0 : index
    %c0_2 = arith.constant 0 : index
    %1 = vector.load %arg2[%c0_1, %c0_2] : memref<32x16xf32, #tpu.memory_space<vmem>>, vector<32x16xf32>
    %c0_3 = arith.constant 0 : index
    %c0_4 = arith.constant 0 : index
    %2 = vector.load %arg3[%c0_3, %c0_4] : memref<32x1xf32, #tpu.memory_space<vmem>>, vector<32x1xf32>
    %cst = arith.constant dense<0.000000e+00> : vector<32x128xf32>
    %3 = tpu.matmul %1, %0, %cst {dimension_numbers = #tpu.dot_dimension_numbers<[1], [0], [0], [1], [0, 0, 1, 1], [], []>} : vector<32x16xf32>, vector<16x128xf32>, vector<32x128xf32> -> vector<32x128xf32>
    %4 = vector.broadcast %2 : vector<32x1xf32> to vector<32x128xf32>
    %5 = arith.addf %3, %4 : vector<32x128xf32>
    %cst_5 = arith.constant 0.000000e+00 : f32
    %6 = vector.broadcast %cst_5 : f32 to vector<32x128xf32>
    %7 = arith.maximumf %5, %6 : vector<32x128xf32>
    %c0_6 = arith.constant 0 : index
    %c0_7 = arith.constant 0 : index
    %8 = vector.load %arg4[%c0_6, %c0_7] : memref<32x32xf32, #tpu.memory_space<vmem>>, vector<32x32xf32>
    %c0_8 = arith.constant 0 : index
    %c0_9 = arith.constant 0 : index
    %9 = vector.load %arg5[%c0_8, %c0_9] : memref<32x1xf32, #tpu.memory_space<vmem>>, vector<32x1xf32>
    %cst_10 = arith.constant dense<0.000000e+00> : vector<32x128xf32>
    %10 = tpu.matmul %8, %7, %cst_10 {dimension_numbers = #tpu.dot_dimension_numbers<[1], [0], [0], [1], [0, 0, 1, 1], [], []>} : vector<32x32xf32>, vector<32x128xf32>, vector<32x128xf32> -> vector<32x128xf32>
    %11 = vector.broadcast %9 : vector<32x1xf32> to vector<32x128xf32>
    %12 = arith.addf %10, %11 : vector<32x128xf32>
    %cst_11 = arith.constant 0.000000e+00 : f32
    %13 = vector.broadcast %cst_11 : f32 to vector<32x128xf32>
    %14 = arith.maximumf %12, %13 : vector<32x128xf32>
    %c0_12 = arith.constant 0 : index
    %c0_13 = arith.constant 0 : index
    %15 = vector.load %arg6[%c0_12, %c0_13] : memref<1x32xf32, #tpu.memory_space<vmem>>, vector<1x32xf32>
    %c0_14 = arith.constant 0 : index
    %c0_15 = arith.constant 0 : index
    %16 = vector.load %arg7[%c0_14, %c0_15] : memref<1x1xf32, #tpu.memory_space<vmem>>, vector<1x1xf32>
    %cst_16 = arith.constant dense<0.000000e+00> : vector<1x128xf32>
    %17 = tpu.matmul %15, %14, %cst_16 {dimension_numbers = #tpu.dot_dimension_numbers<[1], [0], [0], [1], [0, 0, 1, 1], [], []>} : vector<1x32xf32>, vector<32x128xf32>, vector<1x128xf32> -> vector<1x128xf32>
    %18 = vector.broadcast %16 : vector<1x1xf32> to vector<1x128xf32>
    %19 = arith.addf %17, %18 : vector<1x128xf32>
    %cst_17 = arith.constant 0.000000e+00 : f32
    %20 = vector.broadcast %cst_17 : f32 to vector<1x128xf32>
    %21 = arith.subf %20, %19 : vector<1x128xf32>
    %22 = math.exp %21 : vector<1x128xf32>
    %cst_18 = arith.constant 1.000000e+00 : f32
    %23 = vector.broadcast %cst_18 : f32 to vector<1x128xf32>
    %24 = arith.addf %23, %22 : vector<1x128xf32>
    %25 = tpu.reciprocal %24 {approx = true} : vector<1x128xf32> -> vector<1x128xf32>
    %c0_19 = arith.constant 0 : index
    %c0_20 = arith.constant 0 : index
    %26 = vector.load %arg8[%c0_19, %c0_20] : memref<1x128xf32, #tpu.memory_space<vmem>>, vector<1x128xf32>
    tpu.vector_store %arg8[%c0_19, %c0_20], %25 {strides = array<i32>} : memref<1x128xf32, #tpu.memory_space<vmem>>, vector<1x128xf32>,
    return
  }
  func.func @transform_0(%arg0: i32) -> (i32, i32) {
    %c0_i32 = arith.constant 0 : i32
    %c0_i32_0 = arith.constant 0 : i32
    return %c0_i32, %arg0 : i32, i32
  }
  func.func @transform_1(%arg0: i32) -> (i32, i32) {
    %c0_i32 = arith.constant 0 : i32
    %c0_i32_0 = arith.constant 0 : i32
    %c0_i32_1 = arith.constant 0 : i32
    return %c0_i32, %c0_i32_0 : i32, i32
  }
  func.func @transform_2(%arg0: i32) -> (i32, i32) {
    %c0_i32 = arith.constant 0 : i32
    %c0_i32_0 = arith.constant 0 : i32
    %c0_i32_1 = arith.constant 0 : i32
    return %c0_i32, %c0_i32_0 : i32, i32
  }
  func.func @transform_3(%arg0: i32) -> (i32, i32) {
    %c0_i32 = arith.constant 0 : i32
    %c0_i32_0 = arith.constant 0 : i32
    %c0_i32_1 = arith.constant 0 : i32
    return %c0_i32, %c0_i32_0 : i32, i32
  }
  func.func @transform_4(%arg0: i32) -> (i32, i32) {
    %c0_i32 = arith.constant 0 : i32
    %c0_i32_0 = arith.constant 0 : i32
    %c0_i32_1 = arith.constant 0 : i32
    return %c0_i32, %c0_i32_0 : i32, i32
  }
  func.func @transform_5(%arg0: i32) -> (i32, i32) {
    %c0_i32 = arith.constant 0 : i32
    %c0_i32_0 = arith.constant 0 : i32
    %c0_i32_1 = arith.constant 0 : i32
    return %c0_i32, %c0_i32_0 : i32, i32
  }
  func.func @transform_6(%arg0: i32) -> (i32, i32) {
    %c0_i32 = arith.constant 0 : i32
    %c0_i32_0 = arith.constant 0 : i32
    %c0_i32_1 = arith.constant 0 : i32
    return %c0_i32, %c0_i32_0 : i32, i32
  }
  func.func @transform_7(%arg0: i32) -> (i32, i32) {
    %c0_i32 = arith.constant 0 : i32
    %c0_i32_0 = arith.constant 0 : i32
    return %c0_i32, %arg0 : i32, i32
  }
}

</mosaic_0001>

<bundles_post_ra>
// kernel: tpu_custom_call.1
= control target key start
LH: loop header
LB: loop body
LE: loop exit
PB: predicated region body
PF: predicated region fallthrough
CT: control target
= control target key end

     0   :  { %s1164_s0 = inlined_call_operand.vmem [shape: f32[16,256], index: 0, kind: input, shape index: {}]   ;;  %s1165_s1 = inlined_call_operand.vmem [shape: f32[32,16], index: 1, kind: input, shape index: {}]   ;;  %s1166_s2 = inlined_call_operand.vmem [shape: f32[32,1], index: 2, kind: input, shape index: {}]   ;;  %s1167_s3 = inlined_call_operand.vmem [shape: f32[32,32], index: 3, kind: input, shape index: {}]   ;;  %s1168_s4 = inlined_call_operand.vmem [shape: f32[32,1], index: 4, kind: input, shape index: {}]   ;;  %s1169_s5 = inlined_call_operand.vmem [shape: f32[1,32], index: 5, kind: input, shape index: {}]   ;;  %s1170_s6 = inlined_call_operand.<no memory space> [shape: f32[1,1], index: 6, kind: input, shape index: {}]   ;;  %s1171_s7 = inlined_call_operand.hbm [shape: f32[1,256], index: 7, kind: output, shape index: {}]  }
   0x1   :  { %v12_v0 = vstv %s1170_s6 }
   0x2   :  { %13 = vst [vmem:[#allocation2] sm:$0x1] %v12_v0 }
   0x3   :  { %14 = vsyncpa [#allocation5], 0 }
   0x4   :  { %16 = vsyncpa [#allocation5 + $0x1], 0  ;;  %s994_s26 = smov 0   ;;  %s996_s27 = smov 0  }
   0x5   :  { %s998_s28 = smov 0   ;;  %s1000_s29 = smov 0  }
   0x6 LB: > { %s741_s6 = sadd.s32 4294967295, %s944_s29   ;;  %s742_s30 = sadd.s32 4294967294, %s944_s29   ;;  %s944_s29 = sphi %s1000_s29, %s1177_s29   ;;  %s940_s28 = sphi %s998_s28, %s1176_s28   ;;  %s936_s27 = sphi %s996_s27, %s1175_s27   ;;  %s932_s26 = sphi %s994_s26, %s1174_s26  }
   0x7   : > { %s1017_s8 = sadd.s32 1, %s944_s29   ;;  %s29_s9 = sadd.s32 1, %s940_s28 }
   0x8   : > { %s26_s10 = ssub.s32 %s944_s29, %s1017_s8  ;;  %p36_p0 = scmp.ne.s32.totalorder %s940_s28, %s936_s27 }
   0x9   : > { %p27_p1 = scmp.eq.s32.totalorder %s26_s10, 0  ;;  %p37_p2 = scmp.eq.s32.totalorder %s944_s29, 0 }
   0xa   : > { %p192_p3 = scmp.eq.s32.totalorder %s741_s6, 1  ;;  %p197_p4 = scmp.ne.s32.totalorder %s936_s27, %s932_s26 }
   0xb   : > { %s1030_s11 = scalar_select %p27_p1, %s940_s28, %s29_s9  }
   0xc   : > { %p38_p5 = por %p37_p2, %p36_p0  ;;  %p1032_p6 = por %p192_p3, %p36_p0 }
   0xd   : > { %p198_p7 = scmp.eq.s32.totalorder %s742_s30, 1  ;;  %p744_p9 = scmp.ge.s32.totalorder %s944_s29, 2 }
   0xf   : > { %p1036_p8 = por %p198_p7, %p197_p4  ;;  %232 = sbr.rel (%p744_p9) target bundleno = 29 (0x1d), region = 40 }
  0x16   : > { %235 = sbr.rel (!%p38_p5) target bundleno = 29 (0x1d), region = 44  ;;  %s237_s14 = sand.u32 (%p38_p5), 1, %s940_s28  }
  0x17   : > { %s746_s15 = sshll.u32 (%p38_p5), %s944_s29, 3  ;;  %s745_s16 = sshll.u32 (%p38_p5), %s237_s14, 4 }
  0x18   : > { %s241_s19 = scalar_lea.vmem (%p38_p5), %s1164_s0, %s746_s15  ;;  %s239_s20 = scalar_lea.vmem (%p38_p5), [#allocation3], %s745_s16 }
  0x19   : > { %v271_v1 = vld [vmem:[%s241_s19] sm:$0xff] (%p38_p5)  ;;  %v273_v2 = vld [vmem:[%s241_s19 + $0x10] sm:$0xff] (%p38_p5) }
  0x1a   : > { %272 = vst [vmem:[%s239_s20] sm:$0xff] (%p38_p5), %v271_v1  ;;  %274 = vst [vmem:[%s239_s20 + $0x8] sm:$0xff] (%p38_p5), %v273_v2 }
  0x1d PF: > { %p747_p10 = scmp.ge.s32.totalorder %s944_s29, 1  ;;  %p279_p11 = scmp.lt.s32.totalorder %s944_s29, 3 }
  0x1f   : > { %p280_p12 = pnand %p747_p10, %p279_p11 }
  0x20   : > { %s1051_s21 = sand.u32 (!%p280_p12), 1, %s936_s27   ;;  %v318_v3 = vld [vmem:[%s1165_s1] sm:$0xff] (!%p280_p12)  ;;  %vm346_vm0 = vcmask (!%p280_p12), 130048   ;;  %v946_v4 = vmov (!%p280_p12), 0   ;;  %v324_v6 = vld [vmem:[%s1166_s2 + $0x10] sm:$0xff] (!%p280_p12)  ;;  %v323_v9 = vld [vmem:[%s1166_s2 + $0x8] sm:$0xff] (!%p280_p12)  ;;  %v585_v63 = vlaneseq (!%p280_p12) }
  0x21   : > { %283 = sbr.rel (%p280_p12) target bundleno = 751 (0x2ef), region = 82  ;;  %s748_s24 = sshll.u32 (!%p280_p12), %s1051_s21, 4  ;;  %784 = vmatprep.mubr.msk.f32.mxu0 (!%p280_p12), %vm346_vm0, %v318_v3  ;;  %876 = vset.pattern.permute.xlu0 (!%p280_p12), %v946_v4  ;;  %v322_v5 = vld [vmem:[%s1166_s2] sm:$0xff] (!%p280_p12)  ;;  %v325_v11 = vld [vmem:[%s1166_s2 + $0x18] sm:$0xff] (!%p280_p12)  ;;  %v319_v12 = vld [vmem:[%s1165_s1 + $0x8] sm:$0xff] (!%p280_p12)  ;;  %vm476_vm1 = vcmask (!%p280_p12), 261120  }
  0x22   : > { %328 = vperm.xlu0 (!%p280_p12), %876, %v322_v5   ;;  %877 = vset.pattern.permute.xlu1 (!%p280_p12), %v946_v4  ;;  %s288_s14 = scalar_lea.vmem (!%p280_p12), [#allocation3], %s748_s24  ;;  %v452_v13 = vld [vmem:[%s1168_s4] sm:$0xff] (!%p280_p12)  ;;  %v320_v14 = vld [vmem:[%s1165_s1 + $0x10] sm:$0xff] (!%p280_p12)  ;;  %v453_v15 = vld [vmem:[%s1168_s4 + $0x8] sm:$0xff] (!%p280_p12)  ;;  %v947_v42 = vmov (!%p280_p12), 0.0|0.0   ;;  %vm948_vm2 = vmmov (!%p280_p12), 0  }
  0x23   : > { %v316_v7 = vld [vmem:[%s288_s14] sm:$0xff] (!%p280_p12)  ;;  %v317_v8 = vld [vmem:[%s288_s14 + $0x8] sm:$0xff] (!%p280_p12)  ;;  %338 = vperm.xlu1 (!%p280_p12), %877, %v324_v6   ;;  %v949_v43 = vmov (!%p280_p12), 0.0   ;;  %v586_v0 = vshrl.u32 (!%p280_p12), %v585_v63, 7  ;;  %s758_s15 = sshll.u32 (!%p280_p12), %s741_s6, 4  ;;  %s315_s16 = scalar_lea.vmem (!%p280_p12), [#allocation4], %s1051_s21 }
  0x24   : > { %v815_v10 = vpack.c.bf16 (!%p280_p12), %v317_v8, %v316_v7  ;;  %v321_v16 = vld [vmem:[%s1165_s1 + $0x18] sm:$0xff] (!%p280_p12)  ;;  %v454_v17 = vld [vmem:[%s1168_s4 + $0x10] sm:$0xff] (!%p280_p12)  ;;  %v579_v19 = vld [vmem:[#allocation2] sm:$0x1] (!%p280_p12)  ;;  %s681_s17 = sshll.u32 (!%p280_p12), %s315_s16, 4  ;;  %s1120_s20 = scalar_lea.hbm (!%p280_p12), %s1171_s7, %s758_s15  ;;  %s1122_s17 = int_to_ptr.vmem [resolvable:$true] %s681_s17 }
  0x25   : > { %v455_v18 = vld [vmem:[%s1168_s4 + $0x18] sm:$0xff] (!%p280_p12)  ;;  %v448_v20 = vld [vmem:[%s1167_s3] sm:$0xff] (!%p280_p12)  ;;  %v449_v39 = vld [vmem:[%s1167_s3 + $0x8] sm:$0xff] (!%p280_p12)  ;;  %v587_v1 = vsub.s32 (!%p280_p12), 0, %v586_v0  ;;  %s669_s22 = scalar_lea.sflag (!%p280_p12), [#allocation5], %s1051_s21  ;;  %s882_s23 = scalar_lea.vmem (!%p280_p12), %s1122_s17, 16 }
  0x26   : > { %816 = vmatprep.subr.bf16.mxu0 (!%p280_p12), %v815_v10  ;;  %333 = vperm.xlu0 (!%p280_p12), %876, %v323_v9   ;;  %v450_v40 = vld [vmem:[%s1167_s3 + $0x10] sm:$0xff] (!%p280_p12)  ;;  %v451_v41 = vld [vmem:[%s1167_s3 + $0x18] sm:$0xff] (!%p280_p12)  ;;  %v578_v62 = vld [vmem:[%s1169_s5] sm:$0x1] (!%p280_p12)  ;;  %p883_p13 = scmp.ne.s32.totalorder (!%p280_p12), %s1122_s17, %s882_s23  ;;  %s950_s6 = smov (!%p280_p12), [#allocation4]  }
  0x27   : > { %818 = vmatpush3.bf16.msra.mxu0 (!%p280_p12), %v815_v10  ;;  %343 = vperm.xlu1 (!%p280_p12), %877, %v325_v11   ;;  %s886_s24 = sshll.u32 (!%p280_p12), %s950_s6, 4  ;;  %s887_s24 = int_to_ptr.vmem [resolvable:$false] %s886_s24 }
  0x28   : > { %798 = vmatprep.mubr.msk.f32.mxu1 %vm476_vm1, %v448_v20  ;;  %827 = vmatprep.subr.bf16.mxu0 %v947_v42  ;;  %p884_p0 = pnand %p883_p13, %p1032_p6  ;;  %s888_s25 = scalar_lea.vmem %s887_s24, 32 }
  0x29   : > { %p889_p2 = scmp.lt.s32.totalorder %s1122_s17, %s887_s24  ;;  %p890_p3 = scmp.lt.s32.totalorder %s888_s25, %s882_s23 }
  0x2a   : > { %785 = vmatmul.mubr.msk.f32.vlgmr.msra.gmra.mrb[0].mxu0 %vm346_vm0, %v319_v12  ;;  %458 = vperm.xlu0 %876, %v452_v13   ;;  %p885_p1 = pneg %p884_p0 }
  0x2b   : > { %787 = vmatprep.mubr.msk.f32.mxu0 %vm346_vm0, %v320_v14  ;;  %463 = vperm.xlu1 %877, %v453_v15   ;;  %p891_p4 = por %p890_p3, %p889_p2 }
  0x2d   : > { %p892_p5 = pnand %p891_p4, %p885_p1 }
  0x2e   : > { %788 = vmatmul.mubr.msk.f32.gmra.mrb[2].mxu0 %vm346_vm0, %v321_v16  ;;  %468 = vperm.xlu0 %876, %v454_v17  }
  0x2f   : > { %473 = vperm.xlu1 %877, %v455_v18   ;;  %812 = vmatprep.mubr.msk.f32.mxu0 %vm948_vm2, %v949_v43 }
  0x32   : > { %582 = vperm.xlu0 %876, %v579_v19  }
  0xa1   : > { %v329_v21 = vpop.permute.xlu0 %328 }
  0xa2   : > { %v339_v22 = vpop.permute.xlu1 %338 }
  0xa5   : > { %v334_v23 = vpop.permute.xlu0 %333 }
  0xa6   : > { %v344_v29 = vpop.permute.xlu1 %343 }
  0xa9   : > { %v459_v45 = vpop.permute.xlu0 %458 }
  0xaa   : > { %v464_v44 = vpop.permute.xlu1 %463 }
  0xad   : > { %v469_v54 = vpop.permute.xlu0 %468 }
  0xae   : > { %v474_v51 = vpop.permute.xlu1 %473 }
  0xb1   : > { %v583_v2 = vpop.permute.xlu0 %582 }
  0xb2   : > { %v588_v3 = vrot.slane %v583_v2, %v587_v1 }
  0xfd   : > { %v786_v24 = vpop.f32.mrb[0].mxu0 }
  0xfe   : > { %v431_v25 = vadd.f32 %v786_v24, %v334_v23  ;;  %v425_v26 = vpop.f32.mrb[1].mxu0 }
  0xff   : > { %v426_v27 = vadd.f32 %v425_v26, %v329_v21 }
 0x100   : > { %v445_v28 = vmax.f32 %v431_v25, 0.0 }
 0x101   : > { %v444_v30 = vmax.f32 %v426_v27, 0.0  ;;  %v789_v31 = vpop.f32.mrb[2].mxu0 }
 0x102   : > { %v441_v32 = vadd.f32 %v789_v31, %v344_v29  ;;  %v435_v33 = vpop.f32.mrb[3].mxu0 }
 0x103   : > { %v436_v34 = vadd.f32 %v435_v33, %v339_v22  ;;  %v819_v35 = vpack.c.bf16 %v445_v28, %v444_v30 }
 0x104   : > { %v447_v36 = vmax.f32 %v441_v32, 0.0 }
 0x105   : > { %v446_v37 = vmax.f32 %v436_v34, 0.0  ;;  %820 = vmatprep.subr.bf16.mxu1 %v819_v35 }
 0x106   : > { %822 = vmatpush3.bf16.msra.mxu1 %v819_v35 }
 0x107   : > { %v823_v38 = vpack.c.bf16 %v447_v36, %v446_v37 }
 0x109   : > { %824 = vmatprep.subr.bf16.mxu1 %v823_v38 }
 0x10a   : > { %826 = vmatpush3.bf16.msra.mxu1 %v823_v38 }
 0x10d   : > { %799 = vmatmul.mubr.msk.f32.vlgmr.msra.gmra.mrb[0].mxu1 %vm476_vm1, %v449_v39 }
 0x10e   : > { %801 = vmatprep.mubr.msk.f32.mxu1 %vm476_vm1, %v450_v40 }
 0x111   : > { %802 = vmatmul.mubr.msk.f32.gmra.mrb[2].mxu1 %vm476_vm1, %v451_v41 }
 0x1e0   : > { %v800_v46 = vpop.f32.mrb[0].mxu1 }
 0x1e1   : > { %v561_v47 = vadd.f32 %v800_v46, %v464_v44  ;;  %v555_v48 = vpop.f32.mrb[1].mxu1 }
 0x1e2   : > { %v556_v49 = vadd.f32 %v555_v48, %v459_v45 }
 0x1e3   : > { %v575_v50 = vmax.f32 %v561_v47, 0.0 }
 0x1e4   : > { %v574_v52 = vmax.f32 %v556_v49, 0.0  ;;  %v803_v53 = vpop.f32.mrb[2].mxu1 }
 0x1e5   : > { %v571_v55 = vadd.f32 %v803_v53, %v474_v51  ;;  %v565_v56 = vpop.f32.mrb[3].mxu1 }
 0x1e6   : > { %v828_v57 = vpack.c.bf16 %v575_v50, %v574_v52  ;;  %v566_v58 = vadd.f32 %v565_v56, %v469_v54 }
 0x1e7   : > { %v577_v59 = vmax.f32 %v571_v55, 0.0 }
 0x1e8   : > { %v576_v60 = vmax.f32 %v566_v58, 0.0  ;;  %829 = vmatpush3.bf16.msra.mxu0 %v828_v57 }
 0x1e9   : > { %830 = vmatprep.subr.bf16.mxu0 %v947_v42 }
 0x1ea   : > { %v831_v61 = vpack.c.bf16 %v577_v59, %v576_v60 }
 0x1ec   : > { %832 = vmatpush3.bf16.msra.mxu0 %v831_v61 }
 0x1ef   : > { %813 = vmatmul.mubr.msk.f32.vlgmr.msra.gmra.mrb[4].mxu0 %vm476_vm1, %v578_v62 }
 0x2c2   : > { %v658_v4 = vpop.f32.mrb[4].mxu0 }
 0x2c3   : > { %v659_v5 = vadd.f32 %v658_v4, %v588_v3  ;;  %v814_v6 = vpop.f32.mrb[5].mxu0 }
 0x2c5   : > { %v662_v7 = vsub.f32 0.0, %v659_v5 }
 0x2c7   : > { %v663_v8 = vmul.f32 1.442695, %v662_v7 }
 0x2c9   : > { %878 = vpow2.f32 %v663_v8 }
 0x2d3   : > { %v879_v9 = vpop.eup %878 }
 0x2d4   : > { %v665_v10 = vadd.f32 1.0, %v879_v9 }
 0x2d6   : > { %880 = vrcp.f32 %v665_v10 }
 0x2e0   : > { %v881_v11 = vpop.eup %880 }
 0x2e1   : > { %667 = vst [vmem:[%s315_s16] sm:$0x1] %v881_v11 }
 0x2e2   : > { %895 = shalt.err (!%p892_p5)
}
 0x2e3   : > { %s896_s21 = scalar_lea.hbm %s1120_s20, 16  ;;  %s900_s10 = scalar_lea.hbm %s1171_s7, 32 }
 0x2e4   : > { %p897_p7 = scmp.ne.s32.totalorder %s1120_s20, %s896_s21  ;;  %p901_p12 = scmp.lt.u32.totalorder %s1120_s20, %s1171_s7 }
 0x2e5   : > { %p902_p13 = scmp.lt.u32.totalorder %s900_s10, %s896_s21  ;;  %p904_p1 = scmp.lt.u32.totalorder %s896_s21, %s1120_s20 }
 0x2e6   : > { %p898_p10 = pnand %p897_p7, %p1032_p6 }
 0x2e7   : > { %p903_p0 = por %p902_p13, %p901_p12 }
 0x2e8   : > { %p899_p11 = pneg %p898_p10 }
 0x2e9   : > { %p905_p2 = por %p904_p1, %p903_p0 }
 0x2eb   : > { %p906_p3 = pnand %p905_p2, %p899_p11 }
 0x2ed   : > { %909 = shalt.err (!%p906_p3)
}
 0x2ee   : > { %833 = dma.vmem_to_hbm [thread:$0]  (%p1032_p6), %s1122_s17, 16, %s1120_s20, %s669_s22  }
 0x2ef PF: > { %s693_s16 = sand.u32 1, %s932_s26   ;;  %p836_p4 = pnand %p744_p9, %p1036_p8 }
 0x2f0   : > { %s694_s18 = scalar_lea.sflag [#allocation5], %s693_s16 }
 0x2f1   : > { %927 = dma.done.wait (!%p836_p4), %s694_s18, 16  }
 0x2f2   : > { %929 = vsyncadd (!%p836_p4), %s694_s18, 4294967280  ;;  %p19_p5 = scmp.ge.s32.totalorder %s1017_s8, 4   ;;  %s1174_s26 = smov %s936_s27 }
 0x2f3   : > { %s1175_s27 = smov %s940_s28  ;;  %s1176_s28 = smov %s1030_s11 }
 0x2f4   : > { %s1177_s29 = smov %s1017_s8  ;;  %21 = sbr.rel (!%p19_p5) target bundleno = 6 (0x6), region = 126 }
 0x2fb   :  { %698 = vsyncpa [#allocation5], 1 }
 0x2fc   :  { %700 = vsyncpa [#allocation5 + $0x1], 1 }

</bundles_post_ra>
